<compile_context>
chip_gen: v5e
topology: v5e:2x2
jax: 0.10.0
libtpu: 0.0.40
codegen_flags: <defaults>
</compile_context>

<pallas_src>
import functools

import jax
import jax.numpy as jnp
from jax.experimental import pallas as pl
from jax.experimental.pallas import tpu as pltpu


def _upsample_kernel(x_ref, c_ref, o_ref, *, g, W, f, acc_dtype):
    # x_ref: (tr, g*W)      g consecutive input rows packed along lanes
    # c_ref: (W, f*W)       one-hot W-expansion matrix, shared by all groups
    # o_ref: (tr, g*f*f*W)  contiguous slab of the upsampled output
    parts = []
    for j in range(g):                                   # static unroll over lane groups
        xg = x_ref[:, j * W:(j + 1) * W]                 # (tr, W) static lane slice
        yg = jnp.dot(xg, c_ref[...], preferred_element_type=acc_dtype)  # (tr, f*W)
        parts.extend([yg] * f)                           # H-replication: f lane copies
    out = parts[0] if len(parts) == 1 else jnp.concatenate(parts, axis=-1)
    o_ref[...] = out.astype(o_ref.dtype)                 # single lane-dense full store


def _divisors_up_to(n, cap):
    return [d for d in range(1, min(n, cap) + 1) if n % d == 0]


def _pick_lane_pack(R, W, f, max_g=64):
    """Input rows packed per kernel row so the output (and ideally input) block
    last dim is a multiple of 128 lanes (unmasked vst / dense loads)."""
    per_in, per_out = W, f * f * W
    divs = _divisors_up_to(R, max_g)
    for d in divs:                                       # both sides lane-aligned
        if (d * per_in) % 128 == 0 and (d * per_out) % 128 == 0:
            return d
    for d in divs:                                       # output lane-aligned
        if (d * per_out) % 128 == 0:
            return d
    for d in divs:                                       # output at least 128 wide
        if d * per_out >= 128:
            return d
    return divs[-1] if divs else 1


def _pick_block_rows(R2, bytes_per_row, sublane, budget, min_steps=4):
    """Row-block size: dtype-aware sublane multiple, sized to the VMEM budget,
    capped so the 1-D grid has >= min_steps steps (v7x two-TensorCore sharding).
    No divisibility requirement -- the grid uses cdiv and Pallas handles the
    ragged last block."""
    if R2 <= sublane:
        return R2                                        # full dim is always a legal block
    rup = lambda v: -(-v // sublane) * sublane
    tr_budget = max(sublane, (budget // max(bytes_per_row, 1)) // sublane * sublane)
    tr_steps = rup(-(-R2 // min_steps))
    return max(sublane, min(tr_budget, tr_steps))


def upsample_nearest(x, factor=2):
    """Equivalent of F.interpolate(x, scale_factor=factor) (mode='nearest') for NCHW."""
    f = int(factor)
    # TODO(synk): non-integer scale_factor (PyTorch floor index mapping) not implemented.
    N, C, H, W = x.shape
    if f == 1:
        return x
    Hf, Wf = H * f, W * f
    R = N * C * H                                        # flattened input rows

    floating = jnp.issubdtype(x.dtype, jnp.floating)
    # TODO(synk): integer inputs round-trip through float32 (exact only up to 2**24).
    cdtype = x.dtype if floating else jnp.float32

    g = _pick_lane_pack(R, W, f)                         # lane-pack factor
    R2 = R // g
    in_cols = g * W
    out_cols = g * f * f * W

    # One-hot W-expansion matrix: C[w, w*f + j] = 1 for j in [0, f).
    cols = jnp.arange(f * W)
    Cmat = (jnp.arange(W)[:, None] == (cols[None, :] // f)).astype(cdtype)

    x_wide = x.reshape(R2, in_cols)                      # contiguous (free) view
    if x_wide.dtype != cdtype:
        x_wide = x_wide.astype(cdtype)

    isz = jnp.dtype(cdtype).itemsize
    osz = jnp.dtype(x.dtype).itemsize
    sublane = max(8, 32 // max(isz, 1))                  # 8 (f32) / 16 (bf16) / 32 (int8)
    c_bytes = W * f * W * isz                            # resident C (double-buffered)
    # Budget for the double-buffered streamed in/out blocks, leaving room for C
    # and compiler scratch under a 32 MiB scoped-VMEM limit valid on all TPU gens.
    stream_budget = max(2 * 1024 * 1024, 12 * 1024 * 1024 - 2 * c_bytes)
    bytes_per_row = 2 * (in_cols * isz + out_cols * osz)
    tr = _pick_block_rows(R2, bytes_per_row, sublane, stream_budget)
    grid = (pl.cdiv(R2, tr),)

    kernel = functools.partial(_upsample_kernel, g=g, W=W, f=f, acc_dtype=cdtype)

    out = pl.pallas_call(
        kernel,
        out_shape=jax.ShapeDtypeStruct((R2, out_cols), x.dtype),
        grid=grid,
        in_specs=[
            pl.BlockSpec((tr, in_cols), lambda i: (i, 0)),   # streamed input row blocks
            pl.BlockSpec((W, f * W), lambda i: (0, 0)),      # tiny C, resident across grid
        ],
        out_specs=pl.BlockSpec((tr, out_cols), lambda i: (i, 0)),
        compiler_params=pltpu.CompilerParams(
            dimension_semantics=("parallel",),
            vmem_limit_bytes=32 * 1024 * 1024,
        ),
    )(x_wide, Cmat)

    # Contiguous (free) reshape: (R2, g*f*f*W) row-major is exactly (N, C, Hf, Wf).
    return out.reshape(N, C, Hf, Wf)


if __name__ == "__main__":
    key = jax.random.PRNGKey(0)
    # Small NCHW input consistent with the module's forward (4D conv-style input).
    x = jax.random.normal(key, (2, 4, 16, 16), dtype=jnp.float32)

    y = upsample_nearest(x, factor=2)
    y = jax.block_until_ready(y)

    # Pure-JAX reference for nearest upsampling with integer factor.
    ref = jnp.repeat(jnp.repeat(x, 2, axis=2), 2, axis=3)

    assert y.shape == (2, 4, 32, 32), y.shape
    assert y.dtype == x.dtype
    assert jnp.array_equal(y, ref), "mismatch vs reference"

    print("KERNEL_OK")
</pallas_src>

<mosaic_0001>
module attributes {stable_mosaic.version = 11 : i64} {
  func.func @_upsample_kernel(%arg0: i32, %arg1: memref<8x128xf32, #tpu.memory_space<vmem>>, %arg2: memref<16x32xf32, #tpu.memory_space<vmem>>, %arg3: memref<8x512xf32, #tpu.memory_space<vmem>>) attributes {dimension_semantics = [#tpu.dimension_semantics<parallel>], iteration_bounds = array<i64: 2>, scalar_prefetch = 0 : i64, scratch_operands = 0 : i64, tpu.core_type = #tpu.core_type<tc>, window_params = [{transform_indices = @transform_0, window_bounds = array<i64: 8, 128>}, {pipeline_mode = #tpu.pipeline_mode<synchronous>, transform_indices = @transform_1, window_bounds = array<i64: 16, 32>}, {transform_indices = @transform_2, window_bounds = array<i64: 8, 512>}]} {
    %c0 = arith.constant 0 : index
    %c0_0 = arith.constant 0 : index
    %0 = vector.load %arg1[%c0, %c0_0] : memref<8x128xf32, #tpu.memory_space<vmem>>, vector<8x16xf32>
    %c0_1 = arith.constant 0 : index
    %c0_2 = arith.constant 0 : index
    %1 = vector.load %arg2[%c0_1, %c0_2] : memref<16x32xf32, #tpu.memory_space<vmem>>, vector<16x32xf32>
    %cst = arith.constant dense<0.000000e+00> : vector<8x32xf32>
    %2 = tpu.matmul %0, %1, %cst {dimension_numbers = #tpu.dot_dimension_numbers<[1], [0], [0], [1], [0, 0, 1, 1], [], []>} : vector<8x16xf32>, vector<16x32xf32>, vector<8x32xf32> -> vector<8x32xf32>
    %c0_3 = arith.constant 0 : index
    %c16 = arith.constant 16 : index
    %3 = vector.load %arg1[%c0_3, %c16] : memref<8x128xf32, #tpu.memory_space<vmem>>, vector<8x16xf32>
    %c0_4 = arith.constant 0 : index
    %c0_5 = arith.constant 0 : index
    %4 = vector.load %arg2[%c0_4, %c0_5] : memref<16x32xf32, #tpu.memory_space<vmem>>, vector<16x32xf32>
    %cst_6 = arith.constant dense<0.000000e+00> : vector<8x32xf32>
    %5 = tpu.matmul %3, %4, %cst_6 {dimension_numbers = #tpu.dot_dimension_numbers<[1], [0], [0], [1], [0, 0, 1, 1], [], []>} : vector<8x16xf32>, vector<16x32xf32>, vector<8x32xf32> -> vector<8x32xf32>
    %c0_7 = arith.constant 0 : index
    %c32 = arith.constant 32 : index
    %6 = vector.load %arg1[%c0_7, %c32] : memref<8x128xf32, #tpu.memory_space<vmem>>, vector<8x16xf32>
    %c0_8 = arith.constant 0 : index
    %c0_9 = arith.constant 0 : index
    %7 = vector.load %arg2[%c0_8, %c0_9] : memref<16x32xf32, #tpu.memory_space<vmem>>, vector<16x32xf32>
    %cst_10 = arith.constant dense<0.000000e+00> : vector<8x32xf32>
    %8 = tpu.matmul %6, %7, %cst_10 {dimension_numbers = #tpu.dot_dimension_numbers<[1], [0], [0], [1], [0, 0, 1, 1], [], []>} : vector<8x16xf32>, vector<16x32xf32>, vector<8x32xf32> -> vector<8x32xf32>
    %c0_11 = arith.constant 0 : index
    %c48 = arith.constant 48 : index
    %9 = vector.load %arg1[%c0_11, %c48] : memref<8x128xf32, #tpu.memory_space<vmem>>, vector<8x16xf32>
    %c0_12 = arith.constant 0 : index
    %c0_13 = arith.constant 0 : index
    %10 = vector.load %arg2[%c0_12, %c0_13] : memref<16x32xf32, #tpu.memory_space<vmem>>, vector<16x32xf32>
    %cst_14 = arith.constant dense<0.000000e+00> : vector<8x32xf32>
    %11 = tpu.matmul %9, %10, %cst_14 {dimension_numbers = #tpu.dot_dimension_numbers<[1], [0], [0], [1], [0, 0, 1, 1], [], []>} : vector<8x16xf32>, vector<16x32xf32>, vector<8x32xf32> -> vector<8x32xf32>
    %c0_15 = arith.constant 0 : index
    %c64 = arith.constant 64 : index
    %12 = vector.load %arg1[%c0_15, %c64] : memref<8x128xf32, #tpu.memory_space<vmem>>, vector<8x16xf32>
    %c0_16 = arith.constant 0 : index
    %c0_17 = arith.constant 0 : index
    %13 = vector.load %arg2[%c0_16, %c0_17] : memref<16x32xf32, #tpu.memory_space<vmem>>, vector<16x32xf32>
    %cst_18 = arith.constant dense<0.000000e+00> : vector<8x32xf32>
    %14 = tpu.matmul %12, %13, %cst_18 {dimension_numbers = #tpu.dot_dimension_numbers<[1], [0], [0], [1], [0, 0, 1, 1], [], []>} : vector<8x16xf32>, vector<16x32xf32>, vector<8x32xf32> -> vector<8x32xf32>
    %c0_19 = arith.constant 0 : index
    %c80 = arith.constant 80 : index
    %15 = vector.load %arg1[%c0_19, %c80] : memref<8x128xf32, #tpu.memory_space<vmem>>, vector<8x16xf32>
    %c0_20 = arith.constant 0 : index
    %c0_21 = arith.constant 0 : index
    %16 = vector.load %arg2[%c0_20, %c0_21] : memref<16x32xf32, #tpu.memory_space<vmem>>, vector<16x32xf32>
    %cst_22 = arith.constant dense<0.000000e+00> : vector<8x32xf32>
    %17 = tpu.matmul %15, %16, %cst_22 {dimension_numbers = #tpu.dot_dimension_numbers<[1], [0], [0], [1], [0, 0, 1, 1], [], []>} : vector<8x16xf32>, vector<16x32xf32>, vector<8x32xf32> -> vector<8x32xf32>
    %c0_23 = arith.constant 0 : index
    %c96 = arith.constant 96 : index
    %18 = vector.load %arg1[%c0_23, %c96] : memref<8x128xf32, #tpu.memory_space<vmem>>, vector<8x16xf32>
    %c0_24 = arith.constant 0 : index
    %c0_25 = arith.constant 0 : index
    %19 = vector.load %arg2[%c0_24, %c0_25] : memref<16x32xf32, #tpu.memory_space<vmem>>, vector<16x32xf32>
    %cst_26 = arith.constant dense<0.000000e+00> : vector<8x32xf32>
    %20 = tpu.matmul %18, %19, %cst_26 {dimension_numbers = #tpu.dot_dimension_numbers<[1], [0], [0], [1], [0, 0, 1, 1], [], []>} : vector<8x16xf32>, vector<16x32xf32>, vector<8x32xf32> -> vector<8x32xf32>
    %c0_27 = arith.constant 0 : index
    %c112 = arith.constant 112 : index
    %21 = vector.load %arg1[%c0_27, %c112] : memref<8x128xf32, #tpu.memory_space<vmem>>, vector<8x16xf32>
    %c0_28 = arith.constant 0 : index
    %c0_29 = arith.constant 0 : index
    %22 = vector.load %arg2[%c0_28, %c0_29] : memref<16x32xf32, #tpu.memory_space<vmem>>, vector<16x32xf32>
    %cst_30 = arith.constant dense<0.000000e+00> : vector<8x32xf32>
    %23 = tpu.matmul %21, %22, %cst_30 {dimension_numbers = #tpu.dot_dimension_numbers<[1], [0], [0], [1], [0, 0, 1, 1], [], []>} : vector<8x16xf32>, vector<16x32xf32>, vector<8x32xf32> -> vector<8x32xf32>
    %24 = tpu.concatenate %2, %2, %5, %5, %8, %8, %11, %11, %14, %14, %17, %17, %20, %20, %23, %23 in 1 : vector<8x32xf32>, vector<8x32xf32>, vector<8x32xf32>, vector<8x32xf32>, vector<8x32xf32>, vector<8x32xf32>, vector<8x32xf32>, vector<8x32xf32>, vector<8x32xf32>, vector<8x32xf32>, vector<8x32xf32>, vector<8x32xf32>, vector<8x32xf32>, vector<8x32xf32>, vector<8x32xf32>, vector<8x32xf32> -> vector<8x512xf32>
    %c0_31 = arith.constant 0 : index
    %c0_32 = arith.constant 0 : index
    %25 = vector.load %arg3[%c0_31, %c0_32] : memref<8x512xf32, #tpu.memory_space<vmem>>, vector<8x512xf32>
    tpu.vector_store %arg3[%c0_31, %c0_32], %24 {strides = array<i32>} : memref<8x512xf32, #tpu.memory_space<vmem>>, vector<8x512xf32>,
    return
  }
  func.func @transform_0(%arg0: i32) -> (i32, i32) {
    %c0_i32 = arith.constant 0 : i32
    %c0_i32_0 = arith.constant 0 : i32
    return %arg0, %c0_i32 : i32, i32
  }
  func.func @transform_1(%arg0: i32) -> (i32, i32) {
    %c0_i32 = arith.constant 0 : i32
    %c0_i32_0 = arith.constant 0 : i32
    %c0_i32_1 = arith.constant 0 : i32
    return %c0_i32, %c0_i32_0 : i32, i32
  }
  func.func @transform_2(%arg0: i32) -> (i32, i32) {
    %c0_i32 = arith.constant 0 : i32
    %c0_i32_0 = arith.constant 0 : i32
    return %arg0, %c0_i32 : i32, i32
  }
}

</mosaic_0001>

<bundles_post_ra>
// kernel: tpu_custom_call.1
= control target key start
LH: loop header
LB: loop body
LE: loop exit
PB: predicated region body
PF: predicated region fallthrough
CT: control target
= control target key end

     0   :  { %7 = vsyncpa [#allocation3], 0  ;;  %s952_s0 = inlined_call_operand.hbm [shape: f32[16,128], index: 0, kind: input, shape index: {}]   ;;  %s953_s1 = inlined_call_operand.hbm [shape: f32[16,32], index: 1, kind: input, shape index: {}]   ;;  %s954_s2 = inlined_call_operand.hbm [shape: f32[16,512], index: 2, kind: output, shape index: {}]  }
   0x1   :  { %9 = vsyncpa [#allocation3 + $0x1], 0 }
   0x2   :  { %10 = vsyncpa [#allocation6], 0 }
   0x3   :  { %11 = vsyncpa [#allocation4], 0 }
   0x4   :  { %13 = vsyncpa [#allocation4 + $0x1], 0  ;;  %s780_s9 = smov 0   ;;  %s782_s10 = smov 0  }
   0x5   :  { %s784_s11 = smov 0   ;;  %s786_s12 = smov 0  }
   0x6 LB: > { %s108_s15 = sshll.u32 %s953_s1, 4  ;;  %s804_s16 = sadd.s32 4294967295, %s753_s12   ;;  %s753_s12 = sphi %s786_s12, %s964_s12   ;;  %s749_s11 = sphi %s784_s11, %s963_s11   ;;  %s745_s10 = sphi %s782_s10, %s962_s10   ;;  %s741_s9 = sphi %s780_s9, %s961_s9   ;;  %s109_s15 = int_to_ptr.hbm [resolvable:$true] %s108_s15 }
   0x7   : > { %p534_p0 = scmp.ge.s32.totalorder %s753_s12, 1  ;;  %p40_p1 = scmp.eq.s32.totalorder %s804_s16, 0 }
   0x8   : > { %p97_p2 = scmp.lt.s32.totalorder %s753_s12, 3  ;;  %s755_s18 = smov [#allocation5]  }
   0x9   : > { %s110_s19 = sshll.u32 %s755_s18, 4  ;;  %s756_s20 = smov 128   ;;  %s111_s19 = int_to_ptr.vmem [resolvable:$true] %s110_s19 }
   0xa   : > { %p809_p3 = pnand %p534_p0, %p97_p2  ;;  %s757_s21 = smov 8  }
   0xb   : > { %s533_s22 = sadd.s32 4294967294, %s753_s12   ;;  %s820_s23 = sadd.s32 1, %s753_s12  }
   0xc   : > { %p565_p4 = pneg %p809_p3  ;;  %s26_s24 = sadd.s32 1, %s749_s11 }
   0xd   : > { %s23_s25 = ssub.s32 %s753_s12, %s820_s23  ;;  %p33_p7 = scmp.ne.s32.totalorder %s749_s11, %s745_s10 }
   0xe   : > { %p566_p6 = pnand %p565_p4, %p40_p1  ;;  %p24_p8 = scmp.eq.s32.totalorder %s23_s25, 0 }
   0xf   : > { %p34_p9 = scmp.eq.s32.totalorder %s753_s12, 0  ;;  %p39_p10 = scmp.ne.s32.totalorder %s745_s10, %s741_s9 }
  0x10   : > { %568 = dma.hbm_to_vmem [thread:$0]  (!%p566_p6), %s109_s15, 256, %s111_s19, [#allocation6], %s756_s20, %s756_s20, %s757_s21  }
  0x11   : > { %p84_p11 = scmp.eq.s32.totalorder %s804_s16, 1  ;;  %p836_p12 = por %p40_p1, %p39_p10 }
  0x12   : > { %s832_s26 = scalar_select %p24_p8, %s749_s11, %s26_s24  }
  0x13   : > { %p840_p13 = por %p84_p11, %p33_p7  ;;  %p90_p0 = scmp.eq.s32.totalorder %s533_s22, 1 }
  0x14   : > { %p35_p2 = por %p34_p9, %p33_p7  ;;  %s124_s29 = sand.u32 1, %s749_s11  }
  0x15   : > { %p845_p4 = por %p90_p0, %p39_p10  ;;  %p578_p6 = scmp.lt.s32.totalorder %s753_s12, 2 }
  0x16   : > { %s537_s3 = sshll.u32 %s124_s29, 3  ;;  %s538_s4 = sshll.u32 %s753_s12, 3 }
  0x17   : > { %s132_s7 = scalar_lea.hbm %s952_s0, %s538_s4  ;;  %s128_s13 = scalar_lea.vmem [#allocation2], %s537_s3 }
  0x18   : > { %s134_s8 = sshll.u32 %s132_s7, 4  ;;  %s136_s14 = sshll.u32 %s128_s13, 4  ;;  %s135_s8 = int_to_ptr.hbm [resolvable:$true] %s134_s8  ;;  %s137_s14 = int_to_ptr.vmem [resolvable:$true] %s136_s14 }
  0x19   : > { %p854_p8 = pnand %p578_p6, %p35_p2  ;;  %s125_s18 = scalar_lea.sflag [#allocation3], %s124_s29 }
  0x1a   : > { %s653_s19 = sshra.s32 %s135_s8, 4  ;;  %s660_s24 = scalar_lea.hbm %s952_s0, 16  ;;  %s654_s19 = int_to_ptr.hbm [resolvable:$true] %s653_s19 }
  0x1b   : > { %s655_s20 = scalar_lea.hbm %s654_s19, 8  ;;  %p657_p9 = pneg %p854_p8 }
  0x1c   : > { %p656_p7 = scmp.ne.s32.totalorder %s654_s19, %s655_s20  ;;  %p661_p0 = scmp.lt.s32.totalorder %s654_s19, %s952_s0 }
  0x1d   : > { %p662_p2 = scmp.lt.s32.totalorder %s660_s24, %s655_s20 }
  0x1e   : > { %p658_p10 = pnand %p657_p9, %p656_p7 }
  0x1f   : > { %p663_p6 = por %p662_p2, %p661_p0 }
  0x20   : > { %p659_p11 = pneg %p658_p10 }
  0x22   : > { %p664_p5 = pnand %p663_p6, %p659_p11 }
  0x24   : > { %667 = shalt.err (!%p664_p5)
}
  0x25   : > { %572 = dma.hbm_to_vmem [thread:$0]  (!%p854_p8), %s135_s8, 128, %s137_s14, %s125_s18  }
  0x26   : > { %145 = sbr.rel (%p809_p3) target bundleno = 440 (0x1b8), region = 28  ;;  %s871_s29 = sand.u32 (!%p809_p3), 1, %s745_s10  }
  0x27   : > { %s540_s4 = sshll.u32 (!%p809_p3), %s871_s29, 3  ;;  %s148_s5 = scalar_lea.sflag (!%p809_p3), [#allocation3], %s871_s29 }
  0x28   : > { %s151_s6 = scalar_lea.vmem (!%p809_p3), [#allocation2], %s540_s4 }
  0x2b   : > { %728 = dma.done.wait (%p836_p12), %s148_s5, 128  }
  0x2c   : > { %730 = vsyncadd (%p836_p12), %s148_s5, 4294967168 }
  0x2d   : > { %732 = dma.done.wait (%p40_p1), [#allocation6], 256  }
  0x2e   : > { %734 = vsyncadd (%p40_p1), [#allocation6], 4294967040  ;;  %v180_v0 = vld [vmem:[#allocation5 + $0x8] sm:$0xff]  ;;  %v178_v1 = vld [vmem:[%s151_s6] sm:$0xff]  ;;  %s758_s17 = smov 16   ;;  %vm181_vm0 = vcmask 130048  }
  0x2f   : > { %v179_v2 = vld [vmem:[#allocation5] sm:$0xff]  ;;  %199 = vmatpush.msra.mxu0 %v180_v0  ;;  %349 = vrot.lane.b32.xlu2 %v178_v1, %s758_s17  ;;  %s759_s7 = smov 112   ;;  %s760_s8 = smov 96   ;;  %vm417_vm1 = vcmask 261120   ;;  %vm419_vm2 = vcmask 523264   ;;  %vm421_vm3 = vcmask 785408  }
  0x30   : > { %205 = vrot.lane.b32.xlu1 %v178_v1, %s759_s7  ;;  %229 = vrot.lane.b32.xlu0 %v178_v1, %s760_s8  ;;  %s761_s27 = smov 64   ;;  %s762_s13 = smov 80  }
  0x31   : > { %200 = vmatpush.msra.mxu0 %v179_v2  ;;  %223 = vmatpush.msra.mxu1 %v180_v0  ;;  %s763_s14 = smov 32   ;;  %s764_s15 = smov 48  }
  0x32   : > { %543 = vmatmul.msk.f32.vlgmr.msra.gmra.mxu0 %vm181_vm0, %v178_v1  ;;  %247 = vmatpush.msra.mxu2 %v180_v0  ;;  %s542_s18 = sshll.u32 %s871_s29, 5  ;;  %s556_s20 = sshll.u32 %s804_s16, 5 }
  0x33   : > { %295 = vmatpush.msrb.mxu0 %v180_v0  ;;  %224 = vmatpush.msra.mxu1 %v179_v2  ;;  %s177_s19 = scalar_lea.vmem [#allocation7], %s542_s18  ;;  %s448_s24 = scalar_lea.hbm %s954_s2, %s556_s20 }
  0x34   : > { %248 = vmatpush.msra.mxu2 %v179_v2  ;;  %271 = vmatpush.msra.mxu3 %v180_v0  ;;  %s450_s25 = sshll.u32 %s177_s19, 4  ;;  %s452_s3 = sshll.u32 %s448_s24, 4  ;;  %s451_s25 = int_to_ptr.vmem [resolvable:$true] %s450_s25  ;;  %s453_s3 = int_to_ptr.hbm [resolvable:$true] %s452_s3 }
  0x35   : > { %296 = vmatpush.msrb.mxu0 %v179_v2  ;;  %319 = vmatpush.msrb.mxu1 %v180_v0  ;;  %s437_s16 = scalar_lea.sflag [#allocation4], %s871_s29  ;;  %s697_s4 = sshra.s32 %s453_s3, 4  ;;  %s698_s4 = int_to_ptr.hbm [resolvable:$true] %s697_s4 }
  0x36   : > { %272 = vmatpush.msra.mxu3 %v179_v2  ;;  %343 = vmatpush.msrb.mxu2 %v180_v0  ;;  %s699_s5 = scalar_lea.hbm %s698_s4, 32  ;;  %s703_s7 = scalar_lea.hbm %s954_s2, 64 }
  0x37   : > { %277 = vrot.lane.b32.xlu2 %v178_v1, %s761_s27  ;;  %320 = vmatpush.msrb.mxu1 %v179_v2  ;;  %p700_p1 = scmp.ne.s32.totalorder %s698_s4, %s699_s5  ;;  %p704_p12 = scmp.lt.s32.totalorder %s698_s4, %s954_s2 }
  0x38   : > { %253 = vrot.lane.b32.xlu0 %v178_v1, %s762_s13  ;;  %325 = vrot.lane.b32.xlu1 %v178_v1, %s763_s14  ;;  %p705_p8 = scmp.lt.s32.totalorder %s703_s7, %s699_s5 }
  0x39   : > { %367 = vmatpush.msrb.mxu3 %v180_v0  ;;  %344 = vmatpush.msrb.mxu2 %v179_v2  ;;  %p701_p3 = pnand %p700_p1, %p840_p13 }
  0x3a   : > { %p706_p7 = por %p705_p8, %p704_p12 }
  0x3b   : > { %368 = vmatpush.msrb.mxu3 %v179_v2  ;;  %p702_p5 = pneg %p701_p3 }
  0x3d   : > { %p707_p9 = pnand %p706_p7, %p702_p5 }
  0x40   : > { %301 = vrot.lane.b32.xlu0 %v178_v1, %s764_s15 }
  0x89   : > { %v350_v3 = vpop.permute.xlu2 %349 }
  0x91   : > { %v278_v4 = vpop.permute.xlu2 %277 }
  0x92   : > { %547 = vmatmul.msk.f32.vlgmr.msrb.gmra.mxu0 %vm181_vm0, %v278_v4 }
  0xa2   : > { %v206_v5 = vpop.permute.xlu1 %205  ;;  %v230_v6 = vpop.permute.xlu0 %229 }
  0xa3   : > { %544 = vmatmul.msk.f32.vlgmr.msra.gmra.mxu1 %vm181_vm0, %v206_v5  ;;  %545 = vmatmul.msk.f32.vlgmr.msra.gmra.mxu2 %vm181_vm0, %v230_v6 }
  0xaa   : > { %v254_v7 = vpop.permute.xlu0 %253  ;;  %v326_v8 = vpop.permute.xlu1 %325 }
  0xab   : > { %546 = vmatmul.msk.f32.vlgmr.msra.gmra.mxu3 %vm181_vm0, %v254_v7  ;;  %549 = vmatmul.msk.f32.vlgmr.msrb.gmra.mxu2 %vm181_vm0, %v326_v8 }
  0xaf   : > { %v202_v9 = vpop.f32.mrf.mxu0 }
  0xb0   : > { %374 = vrot.lane.b32.xlu1 %v202_v9, %s763_s14 }
  0xb2   : > { %v302_v10 = vpop.permute.xlu0 %301 }
  0xb3   : > { %548 = vmatmul.msk.f32.vlgmr.msrb.gmra.mxu1 %vm181_vm0, %v302_v10  ;;  %550 = vmatmul.msk.f32.vlgmr.msrb.gmra.mxu3 %vm181_vm0, %v350_v3 }
 0x10f   : > { %v298_v11 = vpop.f32.mrf.mxu0 }
 0x110   : > { %396 = vrot.lane.b32.xlu0 %v298_v11, %s763_s14 }
 0x120   : > { %v226_v12 = vpop.f32.mrf.mxu1 }
 0x121   : > { %378 = vrot.lane.b32.xlu2 %v226_v12, %s761_s27  ;;  %381 = vrot.lane.b32.xlu0 %v226_v12, %s760_s8 }
 0x122   : > { %v375_v20 = vpop.permute.xlu1 %374 }
 0x123   : > { %v418_v21 = vsel %vm417_vm1, %v202_v9, %v375_v20 }
 0x126   : > { %v250_v13 = vpop.f32.mrf.mxu2 }
 0x129   : > { %385 = vrot.lane.b32.xlu2 %v250_v13, %s763_s14 }
 0x12e   : > { %v274_v14 = vpop.f32.mrf.mxu3  ;;  %v346_v17 = vpop.f32.mrf.mxu2 }
 0x12f   : > { %389 = vrot.lane.b32.xlu0 %v274_v14, %s761_s27 }
 0x130   : > { %v322_v15 = vpop.f32.mrf.mxu1 }
 0x131   : > { %400 = vrot.lane.b32.xlu1 %v322_v15, %s761_s27 }
 0x136   : > { %v370_v16 = vpop.f32.mrf.mxu3 }
 0x137   : > { %411 = vrot.lane.b32.xlu2 %v370_v16, %s761_s27  ;;  %414 = vrot.lane.b32.xlu0 %v370_v16, %s760_s8 }
 0x139   : > { %407 = vrot.lane.b32.xlu1 %v346_v17, %s763_s14 }
 0x13f   : > { %403 = vrot.lane.b32.xlu2 %v322_v15, %s760_s8 }
 0x141   : > { %392 = vrot.lane.b32.xlu1 %v274_v14, %s760_s8 }
 0x17b   : > { %v379_v18 = vpop.permute.xlu2 %378 }
 0x17c   : > { %v420_v23 = vsel %vm419_vm2, %v418_v21, %v379_v18 }
 0x182   : > { %v397_v19 = vpop.permute.xlu0 %396 }
 0x183   : > { %v386_v22 = vpop.permute.xlu2 %385  ;;  %v426_v27 = vsel %vm417_vm1, %v298_v11, %v397_v19 }
 0x184   : > { %v423_v38 = vsel %vm417_vm1, %v250_v13, %v386_v22 }
 0x191   : > { %v412_v26 = vpop.permute.xlu2 %411 }
 0x193   : > { %v382_v24 = vpop.permute.xlu0 %381 }
 0x194   : > { %v422_v25 = vsel %vm421_vm3, %v420_v23, %v382_v24 }
 0x195   : > { %432 = vst [vmem:[%s177_s19] sm:$0xff] %v422_v25 }
 0x199   : > { %v404_v30 = vpop.permute.xlu2 %403 }
 0x1a1   : > { %v390_v28 = vpop.permute.xlu0 %389 }
 0x1a2   : > { %v424_v39 = vsel %vm419_vm2, %v423_v38, %v390_v28 }
 0x1a3   : > { %v401_v29 = vpop.permute.xlu1 %400 }
 0x1a4   : > { %v427_v31 = vsel %vm419_vm2, %v426_v27, %v401_v29 }
 0x1a5   : > { %v428_v32 = vsel %vm421_vm3, %v427_v31, %v404_v30 }
 0x1a6   : > { %434 = vst [vmem:[%s177_s19 + $0x10] sm:$0xff] %v428_v32 }
 0x1a9   : > { %v415_v35 = vpop.permute.xlu0 %414 }
 0x1ab   : > { %v408_v33 = vpop.permute.xlu1 %407 }
 0x1ac   : > { %v429_v34 = vsel %vm417_vm1, %v346_v17, %v408_v33 }
 0x1ad   : > { %v430_v36 = vsel %vm419_vm2, %v429_v34, %v412_v26 }
 0x1ae   : > { %v431_v37 = vsel %vm421_vm3, %v430_v36, %v415_v35 }
 0x1af   : > { %435 = vst [vmem:[%s177_s19 + $0x18] sm:$0xff] %v431_v37 }
 0x1b3   : > { %v393_v40 = vpop.permute.xlu1 %392 }
 0x1b4   : > { %v425_v41 = vsel %vm421_vm3, %v424_v39, %v393_v40 }
 0x1b5   : > { %433 = vst [vmem:[%s177_s19 + $0x8] sm:$0xff] %v425_v41 }
 0x1b6   : > { %710 = shalt.err (!%p707_p9)
}
 0x1b7   : > { %563 = dma.vmem_to_hbm [thread:$0]  (%p840_p13), %s451_s25, 512, %s453_s3, %s437_s16  }
 0x1b8 PF: > { %s464_s29 = sand.u32 1, %s741_s9   ;;  %p960_p10 = scmp.ge.s32.totalorder %s753_s12, 2 }
 0x1b9   : > { %s465_s13 = scalar_lea.sflag [#allocation4], %s464_s29 }
 0x1ba   : > { %p574_p11 = pnand %p960_p10, %p845_p4 }
 0x1bc   : > { %p575_p0 = pneg %p574_p11 }
 0x1be   : > { %736 = dma.done.wait (%p575_p0), %s465_s13, 512  }
 0x1bf   : > { %738 = vsyncadd (%p575_p0), %s465_s13, 4294966784  ;;  %p16_p2 = scmp.ge.s32.totalorder %s820_s23, 4   ;;  %s961_s9 = smov %s745_s10 }
 0x1c0   : > { %s962_s10 = smov %s749_s11  ;;  %s963_s11 = smov %s832_s26 }
 0x1c1   : > { %s964_s12 = smov %s820_s23  ;;  %18 = sbr.rel (!%p16_p2) target bundleno = 6 (0x6), region = 77 }
 0x1c6   :  { %471 = vsyncpa [#allocation3], 1 }
 0x1c7   :  { %473 = vsyncpa [#allocation3 + $0x1], 1 }
 0x1c8   :  { %474 = vsyncpa [#allocation6], 1 }
 0x1c9   :  { %475 = vsyncpa [#allocation4], 1 }
 0x1ca   :  { %477 = vsyncpa [#allocation4 + $0x1], 1 }

</bundles_post_ra>
